<compile_context>
chip_gen: v7x
topology: tpu7x:2x2x1
jax: 0.10.0
libtpu: 0.0.40
codegen_flags: <defaults>
</compile_context>

<pallas_src>
import math

import jax
import jax.numpy as jnp
from jax.experimental import pallas as pl
from jax.experimental.pallas import tpu as pltpu


def _round_up(x, m):
    return -(-x // m) * m


# ----------------------------------------------------------------------------
# Pallas kernel: tiled matmul + bias   out = x @ w + b   (f32 accumulation)
# ----------------------------------------------------------------------------
def _proj_kernel(x_ref, w_ref, b_ref, o_ref, acc_ref):
    # x_ref: (tm, tk) bf16/f32, w_ref: (tk, tn), b_ref: (1, tn) f32,
    # o_ref: (tm, tn), acc_ref: (tm, tn) f32
    @pl.when(pl.program_id(2) == 0)
    def _():
        acc_ref[...] = jnp.zeros_like(acc_ref)

    acc_ref[...] += jnp.dot(x_ref[...], w_ref[...],
                            preferred_element_type=jnp.float32)

    @pl.when(pl.program_id(2) == pl.num_programs(2) - 1)
    def _():
        o_ref[...] = (acc_ref[...] + b_ref[...]).astype(o_ref.dtype)


def pallas_projection(x2d, w, b, *, tm=256, tk=512, tn=512,
                      out_dtype=jnp.float32):
    """out = x2d @ w + b.

    x2d: (M, K)   -- cast to w.dtype (bf16 by default) for the MXU
    w  : (K, N)   -- already in compute dtype
    b  : (N,)     -- kept in f32, added after accumulation
    """
    M, K = x2d.shape
    Kw, N = w.shape
    assert K == Kw, (K, Kw)

    x2d = x2d.astype(w.dtype)

    # Sublane granularity of the row tile depends on the packed dtype.
    row_align = 8 * (4 // jnp.dtype(x2d.dtype).itemsize)

    # Clamp tile sizes to the (aligned) problem size.
    tm = min(tm, _round_up(M, row_align))
    tk = min(tk, _round_up(K, 128))
    tn = min(tn, _round_up(N, 128))

    M_pad = _round_up(M, tm)
    K_pad = _round_up(K, tk)
    N_pad = _round_up(N, tn)

    if M_pad != M or K_pad != K:
        x2d = jnp.pad(x2d, ((0, M_pad - M), (0, K_pad - K)))
    if K_pad != K or N_pad != N:
        w = jnp.pad(w, ((0, K_pad - K), (0, N_pad - N)))
    b2d = b.reshape(1, N).astype(jnp.float32)
    if N_pad != N:
        b2d = jnp.pad(b2d, ((0, 0), (0, N_pad - N)))

    grid = (M_pad // tm, N_pad // tn, K_pad // tk)

    out = pl.pallas_call(
        _proj_kernel,
        out_shape=jax.ShapeDtypeStruct((M_pad, N_pad), out_dtype),
        grid_spec=pltpu.PrefetchScalarGridSpec(
            num_scalar_prefetch=0,
            grid=grid,
            in_specs=[
                pl.BlockSpec((tm, tk), lambda i, j, k: (i, k)),  # activations
                pl.BlockSpec((tk, tn), lambda i, j, k: (k, j)),  # weight tile
                pl.BlockSpec((1, tn), lambda i, j, k: (0, j)),   # bias tile
            ],
            out_specs=pl.BlockSpec((tm, tn), lambda i, j, k: (i, j)),
            scratch_shapes=[pltpu.VMEM((tm, tn), jnp.float32)],
        ),
        compiler_params=pltpu.CompilerParams(
            dimension_semantics=("parallel", "parallel", "arbitrary"),
            vmem_limit_bytes=48 * 1024 * 1024,
        ),
    )(x2d, w, b2d)

    if M_pad != M or N_pad != N:
        out = out[:M, :N]
    return out


# ----------------------------------------------------------------------------
# Window gather (torch unfold equivalent), layout plumbing in plain JAX.
# ----------------------------------------------------------------------------
def unfold_channels_last(x, patch_size, step=2):
    """(B, P*P, D) -> (B, L*L, ps*ps*D) with feature order (ki, kj, d).

    Keeps D contiguous in the lane dimension.  For step == patch_size
    (the typical ps=2, stride=2 space-to-depth) this is a pure reshape +
    tiny transpose -- no materialized gather.
    """
    B, NP, D = x.shape
    P = int(round(NP ** 0.5))
    assert P * P == NP, "NUM_PATCHES must be a perfect square"
    L = (P - patch_size) // step + 1
    x4 = x.reshape(B, P, P, D)
    if step == patch_size and P == L * patch_size:
        xw = x4.reshape(B, L, patch_size, L, patch_size, D)
        xw = jnp.transpose(xw, (0, 1, 3, 2, 4, 5))       # (B, L, L, ps, ps, D)
    else:
        idx = step * jnp.arange(L)[:, None] + jnp.arange(patch_size)[None, :]
        xr = x4[:, idx]                                  # (B, L, ps, P, D)
        xrc = xr[:, :, :, idx]                           # (B, L, ps, L, ps, D)
        xw = jnp.transpose(xrc, (0, 1, 3, 2, 4, 5))      # (B, L, L, ps, ps, D)
    return xw.reshape(B, L * L, patch_size * patch_size * D)


def unfold_torch_order(x, patch_size, step=2):
    """Exact torch unfold+reshape feature order (d, ki, kj). Reference only."""
    B, NP, D = x.shape
    P = int(round(NP ** 0.5))
    L = (P - patch_size) // step + 1
    x4 = x.reshape(B, P, P, D)
    idx = step * jnp.arange(L)[:, None] + jnp.arange(patch_size)[None, :]
    xr = x4[:, idx]                                      # (B, L, ps, P, D)
    xrc = xr[:, :, :, idx]                               # (B, L, ps, L, ps, D)
    xw = jnp.transpose(xrc, (0, 1, 3, 5, 2, 4))          # (B, L, L, D, ps, ps)
    return xw.reshape(B, L * L, D * patch_size * patch_size)


# ----------------------------------------------------------------------------
# Merger module (JAX side): parameter init + forward
# ----------------------------------------------------------------------------
class MergerPallas:
    def __init__(self, grid_size, embed_dim, llm_hidden_size=4096, *, key,
                 compute_dtype=jnp.bfloat16):
        self.patch_size = int((576 / grid_size ** 2) ** 0.5)
        self.grid_size = grid_size
        self.embed_dim = embed_dim
        # Stored but unused by forward -- matches the PyTorch module, whose
        # Linear projects to embed_dim, not llm_hidden_size.
        self.llm_hidden_size = llm_hidden_size
        self.compute_dtype = compute_dtype

        ps = self.patch_size
        in_features = embed_dim * ps * ps
        out_features = embed_dim
        self.in_features = in_features
        self.out_features = out_features

        # nn.Linear-style uniform(-1/sqrt(in), 1/sqrt(in)) init.
        k_w, k_b = jax.random.split(key)
        bound = 1.0 / math.sqrt(in_features)
        # self.w is (K, N) with rows in torch's (d, ki, kj) feature order
        # (i.e. W_torch.T), so x_torch_order @ self.w == the PyTorch Linear.
        self.w = jax.random.uniform(k_w, (in_features, out_features),
                                    minval=-bound, maxval=bound,
                                    dtype=jnp.float32)
        self.b = jax.random.uniform(k_b, (out_features,),
                                    minval=-bound, maxval=bound,
                                    dtype=jnp.float32)

        # Permute the weight ROWS once so the kernel can consume features in
        # the lane-friendly (ki, kj, d) order:  row (ki*ps+kj)*D + d.
        w_dkk = self.w.reshape(embed_dim, ps, ps, out_features)
        w_kkd = jnp.transpose(w_dkk, (1, 2, 0, 3)).reshape(in_features,
                                                           out_features)
        self.w_kernel = w_kkd.astype(compute_dtype)

    def __call__(self, x):
        mark = x.ndim <= 2
        if mark:
            x = x[None]
        B = x.shape[0]
        patches = unfold_channels_last(x, self.patch_size, step=2)  # (B,LL,K)
        M = B * patches.shape[1]
        K = patches.shape[2]
        out2d = pallas_projection(patches.reshape(M, K), self.w_kernel, self.b,
                                  out_dtype=x.dtype)
        out = out2d.reshape(B, -1, self.out_features)
        # torch's .squeeze() (all size-1 dims) for the unsqueezed-input path.
        return jnp.squeeze(out) if mark else out

    # Pure-JAX reference using the exact torch feature order + original weight,
    # mirroring the kernel's compute dtype (bf16 inputs, f32 accumulation).
    def reference(self, x):
        mark = x.ndim <= 2
        if mark:
            x = x[None]
        patches = unfold_torch_order(x, self.patch_size, step=2)
        p = patches.astype(self.compute_dtype)
        w = self.w.astype(self.compute_dtype)
        out = jnp.einsum("bmk,kn->bmn", p, w,
                         preferred_element_type=jnp.float32) + self.b
        out = out.astype(x.dtype)
        return jnp.squeeze(out) if mark else out


if __name__ == "__main__":
    key = jax.random.PRNGKey(0)
    k_param, k_x = jax.random.split(key)

    # grid_size=12 -> patch_size = int(sqrt(576/144)) = 2 (the typical config).
    grid_size = 12
    embed_dim = 32          # small hidden size for the synthetic test
    spatial = 8             # 8x8 patch grid -> NUM_PATCHES = 64
    B = 2

    merger = MergerPallas(grid_size, embed_dim, key=k_param)

    x = jax.random.normal(k_x, (B, spatial * spatial, embed_dim),
                          dtype=jnp.float32)

    out = jax.block_until_ready(merger(x))
    ref = jax.block_until_ready(merger.reference(x))
    assert out.shape == ref.shape, (out.shape, ref.shape)
    assert jnp.allclose(out, ref, atol=1e-2, rtol=1e-2), float(
        jnp.max(jnp.abs(out - ref)))

    # 2-D input path (module unsqueezes then squeezes, like the PyTorch code).
    x2 = x[0]
    out2 = jax.block_until_ready(merger(x2))
    ref2 = merger.reference(x2)
    assert out2.shape == ref2.shape, (out2.shape, ref2.shape)
    assert jnp.allclose(out2, ref2, atol=1e-2, rtol=1e-2)

    print("KERNEL_OK")
</pallas_src>

<mosaic_0001>
module attributes {stable_mosaic.version = 11 : i64} {
  func.func @_proj_kernel(%arg0: i32, %arg1: i32, %arg2: i32, %arg3: memref<32x128xbf16, #tpu.memory_space<vmem>>, %arg4: memref<128x128xbf16, #tpu.memory_space<vmem>>, %arg5: memref<1x128xf32, #tpu.memory_space<vmem>>, %arg6: memref<32x128xf32, #tpu.memory_space<vmem>>, %arg7: memref<32x128xf32, #tpu.memory_space<vmem>>) attributes {dimension_semantics = [#tpu.dimension_semantics<parallel>, #tpu.dimension_semantics<parallel>, #tpu.dimension_semantics<arbitrary>], iteration_bounds = array<i64: 1, 1, 1>, scalar_prefetch = 0 : i64, scratch_operands = 1 : i64, tpu.core_type = #tpu.core_type<tc>, window_params = [{transform_indices = @transform_0, window_bounds = array<i64: 32, 128>}, {transform_indices = @transform_1, window_bounds = array<i64: 128, 128>}, {transform_indices = @transform_2, window_bounds = array<i64: 1, 128>}, {transform_indices = @transform_3, window_bounds = array<i64: 32, 128>}]} {
    %c0_i32 = arith.constant 0 : i32
    %0 = arith.cmpi eq, %arg2, %c0_i32 : i32
    %1 = arith.extui %0 : i1 to i32
    %c0_i32_0 = arith.constant 0 : i32
    %2 = arith.cmpi ne, %1, %c0_i32_0 : i32
    scf.if %2 {
      %cst_10 = arith.constant 0.000000e+00 : f32
      %12 = vector.broadcast %cst_10 : f32 to vector<32x128xf32>
      %c0_11 = arith.constant 0 : index
      %c0_12 = arith.constant 0 : index
      %13 = vector.load %arg7[%c0_11, %c0_12] : memref<32x128xf32, #tpu.memory_space<vmem>>, vector<32x128xf32>
      tpu.vector_store %arg7[%c0_11, %c0_12], %12 {strides = array<i32>} : memref<32x128xf32, #tpu.memory_space<vmem>>, vector<32x128xf32>,
    } else {
    }
    %c0 = arith.constant 0 : index
    %c0_1 = arith.constant 0 : index
    %3 = vector.load %arg7[%c0, %c0_1] : memref<32x128xf32, #tpu.memory_space<vmem>>, vector<32x128xf32>
    %c0_2 = arith.constant 0 : index
    %c0_3 = arith.constant 0 : index
    %4 = vector.load %arg3[%c0_2, %c0_3] : memref<32x128xbf16, #tpu.memory_space<vmem>>, vector<32x128xbf16>
    %c0_4 = arith.constant 0 : index
    %c0_5 = arith.constant 0 : index
    %5 = vector.load %arg4[%c0_4, %c0_5] : memref<128x128xbf16, #tpu.memory_space<vmem>>, vector<128x128xbf16>
    %cst = arith.constant dense<0.000000e+00> : vector<32x128xf32>
    %6 = tpu.matmul %4, %5, %cst {dimension_numbers = #tpu.dot_dimension_numbers<[1], [0], [0], [1], [0, 0, 1, 1], [], []>} : vector<32x128xbf16>, vector<128x128xbf16>, vector<32x128xf32> -> vector<32x128xf32>
    %7 = arith.addf %3, %6 : vector<32x128xf32>
    %c0_6 = arith.constant 0 : index
    %c0_7 = arith.constant 0 : index
    %8 = vector.load %arg7[%c0_6, %c0_7] : memref<32x128xf32, #tpu.memory_space<vmem>>, vector<32x128xf32>
    tpu.vector_store %arg7[%c0_6, %c0_7], %7 {strides = array<i32>} : memref<32x128xf32, #tpu.memory_space<vmem>>, vector<32x128xf32>,
    %c0_i32_8 = arith.constant 0 : i32
    %9 = arith.cmpi eq, %arg2, %c0_i32_8 : i32
    %10 = arith.extui %9 : i1 to i32
    %c0_i32_9 = arith.constant 0 : i32
    %11 = arith.cmpi ne, %10, %c0_i32_9 : i32
    scf.if %11 {
      %c0_10 = arith.constant 0 : index
      %c0_11 = arith.constant 0 : index
      %12 = vector.load %arg7[%c0_10, %c0_11] : memref<32x128xf32, #tpu.memory_space<vmem>>, vector<32x128xf32>
      %c0_12 = arith.constant 0 : index
      %c0_13 = arith.constant 0 : index
      %13 = vector.load %arg5[%c0_12, %c0_13] : memref<1x128xf32, #tpu.memory_space<vmem>>, vector<1x128xf32>
      %14 = vector.broadcast %13 : vector<1x128xf32> to vector<32x128xf32>
      %15 = arith.addf %12, %14 : vector<32x128xf32>
      %c0_14 = arith.constant 0 : index
      %c0_15 = arith.constant 0 : index
      %16 = vector.load %arg6[%c0_14, %c0_15] : memref<32x128xf32, #tpu.memory_space<vmem>>, vector<32x128xf32>
      tpu.vector_store %arg6[%c0_14, %c0_15], %15 {strides = array<i32>} : memref<32x128xf32, #tpu.memory_space<vmem>>, vector<32x128xf32>,
    } else {
    }
    return
  }
  func.func @transform_0(%arg0: i32, %arg1: i32, %arg2: i32) -> (i32, i32) {
    %c0_i32 = arith.constant 0 : i32
    return %arg0, %arg2 : i32, i32
  }
  func.func @transform_1(%arg0: i32, %arg1: i32, %arg2: i32) -> (i32, i32) {
    %c0_i32 = arith.constant 0 : i32
    return %arg2, %arg1 : i32, i32
  }
  func.func @transform_2(%arg0: i32, %arg1: i32, %arg2: i32) -> (i32, i32) {
    %c0_i32 = arith.constant 0 : i32
    %c0_i32_0 = arith.constant 0 : i32
    return %c0_i32, %arg1 : i32, i32
  }
  func.func @transform_3(%arg0: i32, %arg1: i32, %arg2: i32) -> (i32, i32) {
    %c0_i32 = arith.constant 0 : i32
    return %arg0, %arg1 : i32, i32
  }
}

</mosaic_0001>

<bundles_post_ra>
// kernel: tpu_custom_call.1
= control target key start
LH: loop header
LB: loop body
LE: loop exit
PB: predicated region body
PF: predicated region fallthrough
CT: control target
= control target key end

     0   :  { %8 = vsyncpa [#allocation4], 0  ;;  %s429_s0 = inlined_call_operand.hbm [shape: bf16[32,128], index: 0, kind: input, shape index: {}]   ;;  %s430_s1 = inlined_call_operand.hbm [shape: bf16[128,128], index: 1, kind: input, shape index: {}]   ;;  %s431_s2 = inlined_call_operand.vmem [shape: f32[1,128], index: 2, kind: input, shape index: {}]   ;;  %s432_s3 = inlined_call_operand.hbm [shape: f32[32,128], index: 3, kind: output, shape index: {}]  }
   0x1   :  { %9 = vsyncpa [#allocation7], 0 }
   0x2   :  { %10 = vsyncpa [#allocation5], 0  ;;  %s363_s12 = smov [#allocation3]   ;;  %s291_s16 = scalar_lea.hbm %s429_s0, 256 }
   0x3   :  { %s16_s13 = sshll.u32 %s363_s12, 4  ;;  %p292_p0 = scmp.ne.s32.totalorder %s429_s0, %s291_s16  ;;  %s17_s13 = int_to_ptr.vmem [resolvable:$true] %s16_s13 }
   0x4   :  { %p295_p1 = scmp.lt.u32.totalorder %s291_s16, %s429_s0 }
   0x6   :  { %p297_p2 = pnand %p295_p1, %p292_p0 }
   0x8   :  { %300 = shalt.err (!%p297_p2)
}
   0x9   :  { %s301_s21 = scalar_lea.vmem %s17_s13, 256  ;;  %p306_p4 = scmp.lt.s32.totalorder %s17_s13, %s17_s13 }
   0xa   :  { %p302_p3 = scmp.ne.s32.totalorder %s17_s13, %s301_s21  ;;  %p307_p5 = scmp.lt.s32.totalorder %s301_s21, %s301_s21 }
   0xc   :  { %p308_p6 = por %p307_p5, %p306_p4 }
   0xe   :  { %p309_p7 = pnand %p308_p6, %p302_p3 }
  0x10   :  { %312 = shalt.err (!%p309_p7)
}
  0x11   :  { %s364_s22 = smov 64   ;;  %s365_s23 = smov 4  }
  0x12   :  { %22 = dma.hbm_to_vmem [thread:$0]  %s429_s0, 256, %s17_s13, [#allocation4], %s364_s22, %s364_s22, %s365_s23  }
  0x13   :  { %s366_s26 = smov [#allocation6]   ;;  %s313_s30 = scalar_lea.hbm %s430_s1, 1024 }
  0x14   :  { %s28_s27 = sshll.u32 %s366_s26, 4  ;;  %p314_p8 = scmp.ne.s32.totalorder %s430_s1, %s313_s30  ;;  %s29_s27 = int_to_ptr.vmem [resolvable:$true] %s28_s27 }
  0x15   :  { %p317_p9 = scmp.lt.u32.totalorder %s313_s30, %s430_s1 }
  0x17   :  { %p319_p10 = pnand %p317_p9, %p314_p8 }
  0x19   :  { %322 = shalt.err (!%p319_p10)
}
  0x1a   :  { %s323_s8 = scalar_lea.vmem %s29_s27, 1024  ;;  %p328_p12 = scmp.lt.s32.totalorder %s29_s27, %s29_s27 }
  0x1b   :  { %p324_p11 = scmp.ne.s32.totalorder %s29_s27, %s323_s8  ;;  %p329_p13 = scmp.lt.s32.totalorder %s323_s8, %s323_s8 }
  0x1d   :  { %p330_p0 = por %p329_p13, %p328_p12 }
  0x1f   :  { %p331_p1 = pnand %p330_p0, %p324_p11 }
  0x21   :  { %334 = shalt.err (!%p331_p1)
}
  0x22   :  { %34 = dma.hbm_to_vmem [thread:$0]  %s430_s1, 1024, %s29_s27, [#allocation7], %s364_s22, %s364_s22, %s365_s23  }
  0x23   :  { %357 = dma.done.wait [#allocation4], 256  }
  0x24   :  { %358 = vsyncadd [#allocation4], 4294967040 }
  0x25   :  { %359 = dma.done.wait [#allocation7], 1024  }
  0x26   :  { %360 = vsyncadd [#allocation7], 4294966272  ;;  %v281_v0 = vld [vmem:[#allocation6] sm:$0xff]   ;;  %v282_v1 = vld [vmem:[#allocation6 + $0x8] sm:$0xff]   ;;  %s367_s11 = smov [#allocation8]  }
  0x27   :  { %254 = vmatprep.subr.bf16.mxu0 %v281_v0  ;;  %v283_v2 = vld [vmem:[#allocation6 + $0x10] sm:$0xff]   ;;  %v284_v3 = vld [vmem:[#allocation6 + $0x18] sm:$0xff]   ;;  %v285_v5 = vld [vmem:[#allocation6 + $0x20] sm:$0xff]   ;;  %s220_s12 = sshll.u32 %s367_s11, 4  ;;  %s221_s12 = int_to_ptr.vmem [resolvable:$true] %s220_s12 }
  0x28   :  { %255 = vmatpush3.bf16.msra.mxu0 %v281_v0  ;;  %v289_v4 = vld [vmem:[#allocation3] sm:$0xff]   ;;  %v286_v6 = vld [vmem:[#allocation6 + $0x28] sm:$0xff]   ;;  %v288_v8 = vld [vmem:[#allocation6 + $0x38] sm:$0xff]   ;;  %s335_s13 = scalar_lea.vmem %s221_s12, 512  ;;  %p340_p3 = scmp.lt.s32.totalorder %s221_s12, %s221_s12 }
  0x29   :  { %256 = vmatprep.subr.bf16.mxu0 %v282_v1  ;;  %270 = vmatprep.mubr.bf16.mxu0 %v289_v4  ;;  %v287_v7 = vld [vmem:[#allocation6 + $0x30] sm:$0xff]   ;;  %v290_v9 = vld [vmem:[#allocation3 + $0x8] sm:$0xff]   ;;  %p336_p2 = scmp.ne.s32.totalorder %s221_s12, %s335_s13  ;;  %p341_p4 = scmp.lt.s32.totalorder %s335_s13, %s335_s13 }
  0x2a   :  { %v243_v10 = vld [vmem:[%s431_s2] ss:$0 sm:$0xff] }
  0x2b   :  { %p342_p5 = por %p341_p4, %p340_p3 }
  0x2c   :  { %257 = vmatpush3.bf16.msra.mxu0 %v282_v1 }
  0x2d   :  { %258 = vmatprep.subr.bf16.mxu0 %v283_v2  ;;  %p343_p6 = pnand %p342_p5, %p336_p2 }
  0x30   :  { %259 = vmatpush3.bf16.msra.mxu0 %v283_v2 }
  0x31   :  { %260 = vmatprep.subr.bf16.mxu0 %v284_v3 }
  0x34   :  { %261 = vmatpush3.bf16.msra.mxu0 %v284_v3 }
  0x35   :  { %262 = vmatprep.subr.bf16.mxu0 %v285_v5 }
  0x38   :  { %263 = vmatpush3.bf16.msra.mxu0 %v285_v5 }
  0x39   :  { %264 = vmatprep.subr.bf16.mxu0 %v286_v6 }
  0x3c   :  { %265 = vmatpush3.bf16.msra.mxu0 %v286_v6 }
  0x3d   :  { %266 = vmatprep.subr.bf16.mxu0 %v287_v7 }
  0x40   :  { %267 = vmatpush3.bf16.msra.mxu0 %v287_v7 }
  0x41   :  { %268 = vmatprep.subr.bf16.mxu0 %v288_v8 }
  0x44   :  { %269 = vmatpush3.bf16.msra.mxu0 %v288_v8 }
  0x47   :  { %271 = vmatmul.mubr.bf16.vlgmr.msra.gmra.mrb[0].mxu0 %v290_v9 }
 0x11a   :  { %v272_v11 = vpop.f32.mrb[0].mxu0 }
 0x11b   :  { %v209_v12 = vadd.f32 %v272_v11, %v243_v10  ;;  %v170_v13 = vpop.f32.mrb[1].mxu0 }
 0x11c   :  { %v207_v14 = vadd.f32 %v243_v10, %v170_v13  ;;  %v273_v15 = vpop.f32.mrb[2].mxu0 }
 0x11d   :  { %213 = vst [vmem:[#allocation8 + $0x10] sm:$0xff] %v209_v12  ;;  %v210_v16 = vadd.f32 %v273_v15, %v243_v10  ;;  %v173_v17 = vpop.f32.mrb[3].mxu0 }
 0x11e   :  { %211 = vst [vmem:[#allocation8] sm:$0xff] %v207_v14  ;;  %v208_v18 = vadd.f32 %v243_v10, %v173_v17 }
 0x11f   :  { %214 = vst [vmem:[#allocation8 + $0x18] sm:$0xff] %v210_v16 }
 0x120   :  { %212 = vst [vmem:[#allocation8 + $0x8] sm:$0xff] %v208_v18 }
 0x121   :  { %346 = shalt.err (!%p343_p6)
}
 0x122   :  { %s347_s15 = scalar_lea.hbm %s432_s3, 512 }
 0x123   :  { %p348_p7 = scmp.ne.s32.totalorder %s432_s3, %s347_s15  ;;  %p351_p8 = scmp.lt.u32.totalorder %s347_s15, %s432_s3 }
 0x125   :  { %p353_p9 = pnand %p351_p8, %p348_p7 }
 0x127   :  { %356 = shalt.err (!%p353_p9)
}
 0x128   :  { %s368_s20 = smov 128   ;;  %s369_s21 = smov 8  }
 0x129   :  { %226 = dma.vmem_to_hbm [thread:$0]  %s221_s12, 512, %s432_s3, [#allocation5], %s368_s20, %s368_s20, %s369_s21  }
 0x12a   :  { %361 = dma.done.wait [#allocation5], 512  }
 0x12b   :  { %362 = vsyncadd [#allocation5], 4294966784 }
 0x12c   :  { %230 = vsyncpa [#allocation4], 1 }
 0x12d   :  { %231 = vsyncpa [#allocation7], 1 }
 0x12e   :  { %232 = vsyncpa [#allocation5], 1 }

</bundles_post_ra>
